<compile_context>
chip_gen: v5e
topology: v5e:2x2
jax: 0.10.0
libtpu: 0.0.40
codegen_flags: <defaults>
</compile_context>

<pallas_src>
import functools

import jax
import jax.numpy as jnp
from jax import lax
from jax.experimental import pallas as pl
from jax.experimental.pallas import tpu as pltpu


# ----------------------------- glue helpers (plain JAX) -----------------------------

def _align_corners_2x_nearest_downsample(x):
    # x: (N, C, H, W) -> (N, C, H//2, W//2), replicating the torch helper exactly.
    src_h, src_w = x.shape[2], x.shape[3]
    trg_h, trg_w = src_h // 2, src_w // 2
    h_inds = jnp.floor(jnp.linspace(0.0, src_h - 1, trg_h) + 0.5).astype(jnp.int32)
    w_inds = jnp.floor(jnp.linspace(0.0, src_w - 1, trg_w) + 0.5).astype(jnp.int32)
    return x[:, :, h_inds, :][:, :, :, w_inds]


def _unfold_nchw(x, kernel_size, stride, padding):
    # Equivalent of torch.nn.functional.unfold: (N, C, H, W) -> (N, C*kh*kw, L),
    # channel dim ordered (c, kh, kw), spatial positions row-major.
    n, c, h, w = x.shape
    kh, kw = kernel_size
    sh, sw = stride
    ph, pw = padding
    xp = jnp.pad(x, ((0, 0), (0, 0), (ph, ph), (pw, pw)))
    ho = (h + 2 * ph - kh) // sh + 1
    wo = (w + 2 * pw - kw) // sw + 1
    cols = []
    for i in range(kh):
        for j in range(kw):
            cols.append(xp[:, :, i:i + sh * ho:sh, j:j + sw * wo:sw])  # (N, C, Ho, Wo)
    patches = jnp.stack(cols, axis=2)                 # (N, C, kh*kw, Ho, Wo)
    return patches.reshape(n, c * kh * kw, ho * wo), ho, wo


def _round_up(x, m):
    return (x + m - 1) // m * m


def _pad_last(x, target):
    pad = target - x.shape[-1]
    if pad == 0:
        return x
    return jnp.pad(x, [(0, 0)] * (x.ndim - 1) + [(0, pad)])


def _fold_overlap_add(rec_patches, hd, wd, c, dk, stride, pad, h, w):
    # Overlapping col2im (the scatter half of conv_transpose2d), done as
    # (dk/stride)^2 dense strided adds (4 for dk=2*stride) instead of dk^2 = 16
    # serialized scatter-adds.
    # rec_patches: (N, L, C*dk*dk), patch axis ordered (c, i, j), rows row-major.
    n = rec_patches.shape[0]
    ph, pw = pad
    p = rec_patches.reshape(n, hd, wd, c, dk, dk)
    full_h = (hd - 1) * stride + dk
    full_w = (wd - 1) * stride + dk
    out = jnp.zeros((n, c, full_h, full_w), rec_patches.dtype)
    for bi in range(dk // stride):
        for bj in range(dk // stride):
            blk = p[:, :, :, :, bi * stride:(bi + 1) * stride,
                                 bj * stride:(bj + 1) * stride]   # (N, hd, wd, C, s, s)
            dense = jnp.transpose(blk, (0, 3, 1, 4, 2, 5)).reshape(
                n, c, hd * stride, wd * stride)
            out = out.at[:, :, bi * stride:bi * stride + hd * stride,
                               bj * stride:bj * stride + wd * stride].add(dense)
    return out[:, :, ph:ph + h, pw:pw + w]


def _vmem_limit_bytes():
    """Generation-aware scoped-VMEM limit: ~3/4 of physical, capped at 100 MiB.

    v5e/v6e (128 MiB physical) -> ~96-100 MiB; v7x (64 MiB physical) -> ~48 MiB.
    """
    default = 64 * 1024 * 1024
    try:
        info = pltpu.get_tpu_info()
        cap = getattr(info, "vmem_capacity_bytes", None)
        if not cap:
            return default
        return int(min(cap * 3 // 4, 100 * 1024 * 1024))
    except Exception:
        return default


# ------------------- pltpu.roll direction probe (resolved once) -------------------

@functools.lru_cache(maxsize=None)
def _roll_like_jnp():
    """True iff pltpu.roll(x, s, a) == jnp.roll(x, s, a) (result[i] = x[i - s])."""
    def probe(x_ref, a_ref, b_ref):
        a_ref[...] = pltpu.roll(x_ref[...], 1, 0)
        b_ref[...] = pltpu.roll(x_ref[...], 1, 1)

    x = jnp.arange(8 * 128, dtype=jnp.float32).reshape(8, 128)
    a, b = pl.pallas_call(
        probe,
        out_shape=(jax.ShapeDtypeStruct((8, 128), jnp.float32),
                   jax.ShapeDtypeStruct((8, 128), jnp.float32)),
    )(x)
    like0 = bool(jnp.array_equal(a, jnp.roll(x, 1, 0)))
    like1 = bool(jnp.array_equal(b, jnp.roll(x, 1, 1)))
    if like0 != like1:
        raise RuntimeError("inconsistent pltpu.roll direction across axes")
    return like0


def _shift_src(x, offset, axis, size, like_jnp):
    """y such that y[.. i ..] = x[.. (i + offset) mod size ..] along `axis`."""
    shift = ((-offset) if like_jnp else offset) % size
    if shift == 0:
        return x
    return pltpu.roll(x, shift, axis)


def _flat_col_eq(idx, wd, target):
    # (idx % wd == target) for small non-negative idx without vector integer
    # div/rem (computed via f32 floor-div; exact for idx < 2**22).
    # Only reached for fuse_size >= 5.
    q = jnp.floor((idx.astype(jnp.float32) + 0.5) / float(wd))
    r = idx.astype(jnp.float32) - q * float(wd)
    return r == float(target)


# ----------------------------- Pallas kernel (hot path) -----------------------------

def _context_attention_kernel(fgp_ref, cwt_ref, dw_ref, mask_ref, rec_ref, arg_ref,
                              *, hd, wd, fuse_size, roll_like_jnp):
    L = hd * wd
    fp = (fuse_size - 1) // 2
    offsets = [o for o in range(-fp, fuse_size - fp) if o != 0]
    f32 = jnp.float32

    fgp = fgp_ref[0]     # (L, CK1p) bf16, fg patches, pre-scaled by 1/temperature
    cwt = cwt_ref[0]     # (CK1p, L) bf16, pre-normalized bg matching patches, ^T
    dw = dw_ref[0]       # (L, CK2p) bf16, bg reconstruction patches
    mask = mask_ref[0]   # (1, L)    f32,  1.0 where the bg patch is valid

    # correlation: corr[p, l] = <fg patch at position p, normalized bg patch l> / T
    # (== F.conv2d(fg, conv_w, padding=1), transposed; 1/T pre-folded into fgp).
    # NN-form MXU matmul, f32 accumulation.
    corr = lax.dot_general(fgp, cwt, (((1,), (0,)), ((), ())),
                           preferred_element_type=f32)              # (L_pos, L_bg)

    # small per-axis index vectors (no (L, L) iota tensors are materialized)
    ridx = lax.broadcasted_iota(jnp.int32, (L, 1), 0)
    cidx = lax.broadcasted_iota(jnp.int32, (1, L), 1)

    def shift2(x, off_r, off_c):
        y = _shift_src(x, off_r, 0, L, roll_like_jnp)
        return _shift_src(y, off_c, 1, L, roll_like_jnp)

    # --- propagate_attention pass 1: identity fk x fk conv over the flat (L, L)
    # correlation matrix == sum_o corr[i+o, j+o], zero padded at the flat ends.
    # Validity is separable: row mask (L,1) x col mask (1,L), applied by multiply.
    acc = corr
    for o in offsets:
        t = shift2(corr, o, o)
        if o > 0:
            vr = (ridx < L - o).astype(f32)
            vc = (cidx < L - o).astype(f32)
        else:
            vr = (ridx >= -o).astype(f32)
            vc = (cidx >= -o).astype(f32)
        acc = acc + t * vr * vc
    corr = acc

    # --- propagate_attention pass 2: same conv after re-flattening both axes in
    # column-major order (torch's (H,W,H,W)->(W,H,W,H) permute).  A +/-1 step in
    # column-major order is a +/-wd flat shift, except on the wd-wide strip where
    # the spatial h coordinate wraps: there it needs an extra +/-1 flat shift, and
    # the corner element falls off the zero padding.  The strip correction is an
    # arithmetic blend with separable (L,1)/(1,L) strip masks; because the row-strip
    # mask is constant along the lane axis, a single extra lane roll of the blended
    # matrix reproduces all four shifted copies (a00/a01/a10/a11) exactly.
    acc = corr
    for o in offsets:
        extra = 1 if o > 0 else -1
        base = o * wd
        a00 = shift2(corr, base, base)
        a10 = _shift_src(a00, extra, 0, L, roll_like_jnp)
        if o > 0:
            sr = ridx >= L - o * wd
            sc = cidx >= L - o * wd
            if o == 1:
                vr = (ridx < L - 1).astype(f32)
                vc = (cidx < L - 1).astype(f32)
            else:
                vr = 1.0 - (sr & _flat_col_eq(ridx, wd, wd - 1)).astype(f32)
                vc = 1.0 - (sc & _flat_col_eq(cidx, wd, wd - 1)).astype(f32)
        else:
            sr = ridx < (-o) * wd
            sc = cidx < (-o) * wd
            if o == -1:
                vr = (ridx >= 1).astype(f32)
                vc = (cidx >= 1).astype(f32)
            else:
                vr = 1.0 - (sr & _flat_col_eq(ridx, wd, 0)).astype(f32)
                vc = 1.0 - (sc & _flat_col_eq(cidx, wd, 0)).astype(f32)
        srf = sr.astype(f32)                          # (L, 1)
        scf = sc.astype(f32)                          # (1, L)
        b = a00 + srf * (a10 - a00)                   # row-stage strip blend
        b1 = _shift_src(b, extra, 1, L, roll_like_jnp)
        t = b + scf * (b1 - b)                        # col-stage strip blend
        acc = acc + t * vr * vc
    corr = acc

    # masked softmax over the bg-patch (lane) axis (torch softmax dim=1).  NOTE: the
    # mask multiplies the logits (masked patches keep logit 0 and stay in the
    # denominator), exactly as in the original deepfill code -- it is intentionally
    # not a -inf masked softmax.
    logits = corr * mask                              # (L, L) * (1, L)
    m = jnp.max(logits, axis=1, keepdims=True)        # (L, 1)
    e = jnp.exp(logits - m)
    denom = jnp.sum(e, axis=1, keepdims=True)         # over ALL bg patches, >= 1
    em = e * mask                                     # masked numerator (f32)

    # first-occurrence argmax over the bg-patch axis, computed from em (exact w.r.t.
    # the approximate reciprocal below; per-row positive scaling preserves argmax).
    # Column index carried in f32: exact for L < 2**24.
    maxv = jnp.max(em, axis=1, keepdims=True)
    cidx_f = cidx.astype(f32)
    arg = jnp.min(jnp.where(em == maxv, cidx_f, float(L)), axis=1, keepdims=True)
    arg_ref[0] = arg.astype(jnp.int32)                # (L, 1)

    # attention weights in bf16 (the MXU consumes bf16 anyway); EUP reciprocal.
    attn = (em * pl.reciprocal(denom, approx=True)).astype(jnp.bfloat16)

    # reconstruction patches: rec[p, :] = sum_l attn[p, l] * deconv_w[l, :]
    # (matmul half of F.conv_transpose2d; the overlapping fold is done in glue).
    # NN-form MXU matmul -- no transpose of attn is required.
    rec = lax.dot_general(attn, dw, (((1,), (0,)), ((), ())),
                          preferred_element_type=f32)               # (L, CK2p)
    rec_ref[0] = rec


# ----------------------------- forward wrapper -----------------------------

def context_attention_forward(fg_feature, bg_feature, masks, *,
                              kernel_size=3, stride=2, fuse_size=3, temperature=0.1):
    ks = (kernel_size, kernel_size)
    dk = (2 * stride, 2 * stride)
    unfold_deconv_pad = tuple((k - s) // 2 for k, s in zip(dk, (stride, stride)))
    unfold_conv_pad = tuple((k - 1) // 2 for k in ks)

    n, c, h, w = fg_feature.shape

    # ---- glue: unfold full-res bg for the reconstruction (deconv) kernels ----
    deconv_w, _, _ = _unfold_nchw(bg_feature, dk, (stride, stride), unfold_deconv_pad)
    deconv_w = jnp.transpose(deconv_w, (0, 2, 1))                     # (N, L, C*dk*dk)

    # ---- glue: 2x nearest (align-corners-ish) downsample ----
    fg_d = _align_corners_2x_nearest_downsample(fg_feature)
    bg_d = _align_corners_2x_nearest_downsample(bg_feature)
    mk_d = _align_corners_2x_nearest_downsample(masks)
    hd, wd = fg_d.shape[2], fg_d.shape[3]
    L = hd * wd

    conv_w, _, _ = _unfold_nchw(bg_d, ks, (1, 1), unfold_conv_pad)
    conv_w = jnp.transpose(conv_w, (0, 2, 1))                         # (N, L, C*k*k)
    fg_patches, _, _ = _unfold_nchw(fg_d, ks, (1, 1), unfold_conv_pad)
    fg_patches = jnp.transpose(fg_patches, (0, 2, 1))                 # (N, L, C*k*k)

    pm, _, _ = _unfold_nchw(mk_d, ks, (1, 1), unfold_conv_pad)        # (N, Cm*k*k, L)
    patch_mask = (jnp.mean(pm, axis=1) == 0.0).astype(jnp.float32)[:, None, :]  # (N,1,L)

    ck1 = conv_w.shape[2]
    ck2 = deconv_w.shape[2]
    ck1p = _round_up(ck1, 128)        # lane-dense fg operand / contraction dim
    ck2p = _round_up(ck2, 128)        # lane-dense rec output block (unmasked vst)

    # per-bg-patch L2 normalisation with clamp (torch: norm.clamp(min=1e-4)), done
    # once in f32 in the wrapper; shipped to the kernel as bf16, pre-transposed so
    # both in-kernel matmuls are NN-form.  Zero padding does not change the products.
    norm = jnp.sqrt(jnp.sum(conv_w * conv_w, axis=2, keepdims=True))
    cwn = (conv_w / jnp.maximum(norm, 1e-4)).astype(jnp.bfloat16)     # (N, L, ck1)
    cwt = jnp.transpose(_pad_last(cwn, ck1p), (0, 2, 1))              # (N, ck1p, L)

    # 1/temperature folded into the fg operand; bf16 MXU inputs, zero lane-padding.
    fgp = _pad_last(fg_patches * (1.0 / temperature), ck1p).astype(jnp.bfloat16)
    dwp = _pad_last(deconv_w, ck2p).astype(jnp.bfloat16)

    kernel = functools.partial(_context_attention_kernel, hd=hd, wd=wd,
                               fuse_size=fuse_size, roll_like_jnp=_roll_like_jnp())

    rec_p, arg = pl.pallas_call(
        kernel,
        out_shape=(jax.ShapeDtypeStruct((n, L, ck2p), jnp.float32),
                   jax.ShapeDtypeStruct((n, L, 1), jnp.int32)),
        grid_spec=pltpu.PrefetchScalarGridSpec(
            num_scalar_prefetch=0,
            grid=(n,),
            in_specs=[
                pl.BlockSpec((1, L, ck1p), lambda b: (b, 0, 0)),   # fg patches (bf16)
                pl.BlockSpec((1, ck1p, L), lambda b: (b, 0, 0)),   # normalized bg^T (bf16)
                pl.BlockSpec((1, L, ck2p), lambda b: (b, 0, 0)),   # deconv weights (bf16)
                pl.BlockSpec((1, 1, L), lambda b: (b, 0, 0)),      # patch mask (lane-dense)
            ],
            out_specs=[
                pl.BlockSpec((1, L, ck2p), lambda b: (b, 0, 0)),
                pl.BlockSpec((1, L, 1), lambda b: (b, 0, 0)),
            ],
        ),
        compiler_params=pltpu.CompilerParams(
            dimension_semantics=("parallel",),       # independent per-image work (megacore)
            vmem_limit_bytes=_vmem_limit_bytes(),    # generation-aware scoped-VMEM cap
        ),
        # TODO(synk): for large L (>= ~1024) add a grid axis tiling the fg-position
        # (row) axis of corr/attn/rec with a +/-(fp*wd + 1) halo so the (L, L)
        # intermediates stay inside v7x's 64 MiB VMEM.
    )(fgp, cwt, dwp, patch_mask)

    rec_patches = rec_p[:, :, :ck2]                                   # drop lane pad

    # ---- glue: overlapping col2im (fold) == scatter half of conv_transpose2d ----
    rec = _fold_overlap_add(rec_patches, hd, wd, c, 2 * stride, stride,
                            unfold_deconv_pad, h, w) / 4.0             # (N, C, H, W)

    arg = arg.reshape(n, L)
    matched = jnp.stack([arg // wd, arg % wd], axis=1).reshape(n, 2, hd, wd)
    return rec, matched


# ----------------------------- plain-JAX reference (for validation) -----------------------------

def _reference_forward(fg_feature, bg_feature, masks, *, kernel_size=3, stride=2,
                       fuse_size=3, temperature=0.1):
    # Torch-faithful reference: fuse via explicit 0/1 shift matrices (independent of
    # the roll-based kernel), old-style 16-scatter fold, same bf16 matmul operands.
    ks = (kernel_size, kernel_size)
    dk = (2 * stride, 2 * stride)
    dpad = tuple((k - s) // 2 for k, s in zip(dk, (stride, stride)))
    cpad = tuple((k - 1) // 2 for k in ks)
    n, c, h, w = fg_feature.shape

    deconv_w, _, _ = _unfold_nchw(bg_feature, dk, (stride, stride), dpad)
    deconv_w = jnp.transpose(deconv_w, (0, 2, 1))
    fg_d = _align_corners_2x_nearest_downsample(fg_feature)
    bg_d = _align_corners_2x_nearest_downsample(bg_feature)
    mk_d = _align_corners_2x_nearest_downsample(masks)
    hd, wd = fg_d.shape[2], fg_d.shape[3]
    L = hd * wd
    conv_w, _, _ = _unfold_nchw(bg_d, ks, (1, 1), cpad)
    conv_w = jnp.transpose(conv_w, (0, 2, 1))
    fg_patches, _, _ = _unfold_nchw(fg_d, ks, (1, 1), cpad)
    fg_patches = jnp.transpose(fg_patches, (0, 2, 1))
    pm, _, _ = _unfold_nchw(mk_d, ks, (1, 1), cpad)
    mask = (jnp.mean(pm, axis=1) == 0.0).astype(jnp.float32)[:, :, None]

    fp_ = (fuse_size - 1) // 2
    offsets = list(range(-fp_, fuse_size - fp_))
    S1 = jnp.stack([jnp.eye(L, k=o, dtype=jnp.float32) for o in offsets], 0)
    hb, wb = jnp.arange(hd), jnp.arange(wd)
    src = (hb[:, None] * wd + wb[None, :]).reshape(-1)
    dst = (wb[None, :] * hd + hb[:, None]).reshape(-1)
    T = jnp.zeros((L, L), jnp.float32).at[dst, src].set(1.0)
    S2 = jnp.einsum('ij,oik,kl->ojl', T, S1, T)

    fgp_b = (fg_patches * (1.0 / temperature)).astype(jnp.bfloat16)
    dw_b = deconv_w.astype(jnp.bfloat16)
    hi = lax.Precision.HIGHEST

    recs, matches = [], []
    for b in range(n):
        cw = conv_w[b]
        norm = jnp.sqrt(jnp.sum(cw * cw, axis=1, keepdims=True))
        cwn = (cw / jnp.maximum(norm, 1e-4)).astype(jnp.bfloat16)
        corr = jnp.dot(cwn, fgp_b[b].T, preferred_element_type=jnp.float32)
        for S in (S1, S2):
            corr = sum(jnp.matmul(jnp.matmul(S[o], corr, precision=hi), S[o].T,
                                  precision=hi) for o in range(fuse_size))
        logits = corr * mask[b]
        attn = mask[b] * jax.nn.softmax(logits, axis=0)
        arg = jnp.argmax(attn, axis=0)
        rec_p = jnp.dot(attn.astype(jnp.bfloat16).T, dw_b[b],
                        preferred_element_type=jnp.float32)            # (L, ck2)
        pmat = rec_p.reshape(hd, wd, c, dk[0], dk[1])
        out = jnp.zeros((c, h + 2 * dpad[0], w + 2 * dpad[1]), jnp.float32)
        for i in range(dk[0]):
            for j in range(dk[1]):
                blk = jnp.transpose(pmat[:, :, :, i, j], (2, 0, 1))
                out = out.at[:, i:i + stride * hd:stride,
                             j:j + stride * wd:stride].add(blk)
        recs.append(out[:, dpad[0]:dpad[0] + h, dpad[1]:dpad[1] + w] / 4.0)
        matches.append(jnp.stack([arg // wd, arg % wd], 0).reshape(2, hd, wd))
    return jnp.stack(recs, 0), jnp.stack(matches, 0).astype(jnp.int32)


# ----------------------------- demo -----------------------------

if __name__ == "__main__":
    key = jax.random.PRNGKey(0)
    k1, k2, k3 = jax.random.split(key, 3)
    # 32x32 spatial -> 16x16 downsampled grid -> L = 256 (lane-aligned correlation tile)
    N, C, H, W = 2, 4, 32, 32

    fg = jax.random.normal(k1, (N, C, H, W), dtype=jnp.float32)
    bg = jax.random.normal(k2, (N, C, H, W), dtype=jnp.float32)
    # binary hole mask (1 = hole); patches whose local mask mean == 0 are valid bg patches
    masks = (jax.random.uniform(k3, (N, 1, H, W)) > 0.6).astype(jnp.float32)

    _roll_like_jnp()    # resolve pltpu.roll's direction convention before tracing

    fwd = jax.jit(functools.partial(context_attention_forward,
                                    kernel_size=3, stride=2,
                                    fuse_size=3, temperature=0.1))
    rec, matched = fwd(fg, bg, masks)
    jax.block_until_ready((rec, matched))

    assert rec.shape == (N, C, H, W), rec.shape
    assert matched.shape == (N, 2, H // 2, W // 2), matched.shape
    assert rec.dtype == jnp.float32 and matched.dtype == jnp.int32

    # validate against the independent plain-JAX reference (bf16-matmul tolerance).
    ref = jax.jit(functools.partial(_reference_forward, kernel_size=3, stride=2,
                                    fuse_size=3, temperature=0.1))
    rec_ref, matched_ref = ref(fg, bg, masks)
    jax.block_until_ready((rec_ref, matched_ref))
    assert jnp.allclose(rec, rec_ref, rtol=5e-2, atol=5e-3), \
        float(jnp.max(jnp.abs(rec - rec_ref)))
    match_rate = float(jnp.mean((matched == matched_ref).astype(jnp.float32)))
    assert match_rate > 0.99, match_rate

    print("KERNEL_OK")
</pallas_src>

<mosaic_0001>
module attributes {stable_mosaic.version = 11 : i64} {
  func.func @probe(%arg0: memref<8x128xf32, #tpu.memory_space<vmem>>, %arg1: memref<8x128xf32, #tpu.memory_space<vmem>>, %arg2: memref<8x128xf32, #tpu.memory_space<vmem>>) attributes {dimension_semantics = [], scalar_prefetch = 0 : i64, scratch_operands = 0 : i64, tpu.core_type = #tpu.core_type<tc>} {
    %c0 = arith.constant 0 : index
    %c0_0 = arith.constant 0 : index
    %0 = vector.load %arg0[%c0, %c0_0] : memref<8x128xf32, #tpu.memory_space<vmem>>, vector<8x128xf32>
    %c1_i32 = arith.constant 1 : i32
    %1 = tpu.dynamic_rotate %0 by %c1_i32 dim 0 : vector<8x128xf32>, i32 -> vector<8x128xf32>
    %c0_1 = arith.constant 0 : index
    %c0_2 = arith.constant 0 : index
    %2 = vector.load %arg1[%c0_1, %c0_2] : memref<8x128xf32, #tpu.memory_space<vmem>>, vector<8x128xf32>
    tpu.vector_store %arg1[%c0_1, %c0_2], %1 {strides = array<i32>} : memref<8x128xf32, #tpu.memory_space<vmem>>, vector<8x128xf32>,
    %c0_3 = arith.constant 0 : index
    %c0_4 = arith.constant 0 : index
    %3 = vector.load %arg0[%c0_3, %c0_4] : memref<8x128xf32, #tpu.memory_space<vmem>>, vector<8x128xf32>
    %c1_i32_5 = arith.constant 1 : i32
    %4 = tpu.dynamic_rotate %3 by %c1_i32_5 dim 1 : vector<8x128xf32>, i32 -> vector<8x128xf32>
    %c0_6 = arith.constant 0 : index
    %c0_7 = arith.constant 0 : index
    %5 = vector.load %arg2[%c0_6, %c0_7] : memref<8x128xf32, #tpu.memory_space<vmem>>, vector<8x128xf32>
    tpu.vector_store %arg2[%c0_6, %c0_7], %4 {strides = array<i32>} : memref<8x128xf32, #tpu.memory_space<vmem>>, vector<8x128xf32>,
    return
  }
}

</mosaic_0001>

<bundles_post_ra>
// kernel: tpu_custom_call.1
= control target key start
LH: loop header
LB: loop body
LE: loop exit
PB: predicated region body
PF: predicated region fallthrough
CT: control target
= control target key end

     0   :  { %8 = vsyncpa [#allocation3], 0  ;;  %s176_s0 = inlined_call_operand.hbm [shape: f32[8,128], index: 0, kind: input, shape index: {}]   ;;  %s177_s1 = inlined_call_operand.hbm [shape: f32[8,128], index: 1, kind: output, shape index: {0}]   ;;  %s178_s2 = inlined_call_operand.hbm [shape: f32[8,128], index: 2, kind: output, shape index: {1}]  }
   0x1   :  { %9 = vsyncpa [#allocation4], 0 }
   0x2   :  { %10 = vsyncpa [#allocation7], 0  ;;  %s16_s11 = sshll.u32 %s176_s0, 4  ;;  %s148_s12 = smov [#allocation2]   ;;  %s17_s11 = int_to_ptr.hbm [resolvable:$true] %s16_s11 }
   0x3   :  { %s18_s13 = sshll.u32 %s148_s12, 4  ;;  %s19_s13 = int_to_ptr.vmem [resolvable:$true] %s18_s13 }
   0x4   :  { %21 = dma.hbm_to_vmem [thread:$0]  %s17_s11, 128, %s19_s13, [#allocation3]  }
   0x5   :  { %142 = dma.done.wait [#allocation3], 128  }
   0x6   :  { %143 = vsyncadd [#allocation3], 4294967168  ;;  %v29_v0 = vld [vmem:[#allocation2] sm:$0xff]  ;;  %s149_s14 = smov 1   ;;  %s150_s15 = smov [#allocation5]  }
   0x7   :  { %30 = vrot.lane.b32.xlu0 %v29_v0, %s149_s14  ;;  %s38_s16 = sshll.u32 %s150_s15, 4  ;;  %s40_s19 = sshll.u32 %s177_s1, 4  ;;  %v27_v1 = vrot.slane %v29_v0, 7  ;;  %s39_s16 = int_to_ptr.vmem [resolvable:$true] %s38_s16  ;;  %s41_s19 = int_to_ptr.hbm [resolvable:$true] %s40_s19 }
   0x8   :  { %s151_s0 = smov [#allocation6]   ;;  %s51_s23 = sshll.u32 %s178_s2, 4  ;;  %s52_s23 = int_to_ptr.hbm [resolvable:$true] %s51_s23 }
   0x9   :  { %28 = vst [vmem:[#allocation5] sm:$0xff] %v27_v1  ;;  %s49_s20 = sshll.u32 %s151_s0, 4  ;;  %s50_s20 = int_to_ptr.vmem [resolvable:$true] %s49_s20 }
   0xa   :  { %43 = dma.vmem_to_hbm [thread:$0]  %s39_s16, 128, %s41_s19, [#allocation4]  }
  0x79   :  { %v31_v2 = vpop.permute.xlu0 %30 }
  0x7a   :  { %32 = vst [vmem:[#allocation6] sm:$0xff] %v31_v2 }
  0x7b   :  { %54 = dma.vmem_to_hbm [thread:$0]  %s50_s20, 128, %s52_s23, [#allocation7]  }
  0x7c   :  { %144 = dma.done.wait [#allocation4], 128  }
  0x7d   :  { %145 = vsyncadd [#allocation4], 4294967168 }
  0x7e   :  { %146 = dma.done.wait [#allocation7], 128  }
  0x7f   :  { %147 = vsyncadd [#allocation7], 4294967168 }
  0x80   :  { %63 = vsyncpa [#allocation3], 1 }
  0x81   :  { %64 = vsyncpa [#allocation4], 1 }
  0x82   :  { %65 = vsyncpa [#allocation7], 1 }

</bundles_post_ra>
